<compile_context>
chip_gen: v7x
topology: tpu7x:2x2x1
jax: 0.10.0
libtpu: 0.0.40
codegen_flags: <defaults>
</compile_context>

<pallas_src>
import jax
import jax.numpy as jnp
from jax import lax
from jax.experimental import pallas as pl
from jax.experimental.pallas import tpu as pltpu

_LANE = 128
_COLLAPSE_MAX_K = 8                     # <= this many columns: no k grid axis
_SMALL_PROBLEM_ELEMS = 65536            # below this traffic, plain XLA gather wins
_VMEM_BUDGET_BYTES = 12 * 1024 * 1024   # conservative vs. 16 MiB v5e scoped default


# --------------------------------------------------------------------------- #
# Kernels
# --------------------------------------------------------------------------- #
def _make_collapsed_kernel(col_specs):
    """No-k-axis kernel. col_specs[j] = (input_ref_index, static_lane_offset)."""
    def kernel(*refs):
        o_ref = refs[-1]
        x_refs = refs[:-1]
        for j, (ti, lane_off) in enumerate(col_specs):
            col = x_refs[ti][:, lane_off:lane_off + 1]       # static 1-lane slice
            o_ref[:, j:j + 1] = col.astype(o_ref.dtype)      # static 1-col store
    return kernel


def _select_kth_kernel(tiles_ref, lanes_ref, cols_ref, x_ref, o_ref):
    # tiles/lanes/cols: SMEM (num_k,) int32 scalar prefetch, sorted by lane tile.
    # x_ref: VMEM (tb, lane)   -- the single lane tile holding sorted column j.
    # o_ref: VMEM (tb, num_k)  -- same block across the k axis (VMEM resident);
    #                             single lane-dense HBM writeback per batch tile.
    j = pl.program_id(1)
    x = x_ref[...]
    lane_ids = lax.broadcasted_iota(jnp.int32, x.shape, 1)
    # Exact-zero mask + reduce picks out the selected column (also masks any
    # padded/ragged lanes).
    # TODO(synk): masked-sum maps a selected -0.0 to +0.0 (allclose-equal, not bit-exact).
    sel = jnp.where(lane_ids == lanes_ref[j], x, jnp.zeros((), x.dtype))
    val = jnp.sum(sel, axis=-1, keepdims=True)               # (tb, 1)
    # Write-only masked store of the single output column (no o_ref load, no init;
    # every column is written exactly once across the k axis).
    col_ids = lax.broadcasted_iota(jnp.int32, o_ref.shape, 1)
    pltpu.store(o_ref,
                jnp.broadcast_to(val.astype(o_ref.dtype), o_ref.shape),
                mask=col_ids == cols_ref[j])


# --------------------------------------------------------------------------- #
# Host-side wrapper
# --------------------------------------------------------------------------- #
def _round_down_to_8(v):
    return max(8, (v // 8) * 8)


def _batch_tile(B, lane, num_k, n_inputs, itemsize):
    # Double-buffered input tiles + double-buffered resident output block.
    per_row = itemsize * 2 * (n_inputs * lane + num_k)
    desired = max(8, min(4096, _VMEM_BUDGET_BYTES // max(per_row, 1)))
    if B < 8:
        return B                                   # block == full dim (allowed)
    return min(_round_down_to_8(desired), _round_down_to_8(B))


def select_kth_logit(x, k, use_pallas=None):
    """Pallas implementation of SelectKthLogit.forward.

    x: (B, N) logits.
    k: python int  -> (B, 1)
       list of int -> (B, len(k))
    use_pallas: True/False to force a path; None = auto (XLA gather for tiny traffic).
    """
    B, N = x.shape
    k_list = [k] if isinstance(k, int) else [int(ki) for ki in k]

    # PyTorch-style validation + negative-index wraparound (static, on host).
    norm = []
    for ki in k_list:
        if ki < -N or ki >= N:
            raise IndexError(
                f"index {ki} is out of bounds for dimension 1 with size {N}")
        norm.append(ki + N if ki < 0 else ki)
    num_k = len(norm)
    if num_k == 0:
        return x[:, jnp.asarray([], dtype=jnp.int32)]

    itemsize = jnp.dtype(x.dtype).itemsize
    lane = _LANE if N >= _LANE else N
    tiles = [ki // lane for ki in norm]
    lanes = [ki % lane for ki in norm]
    unique_tiles = sorted(set(tiles))
    n_unique = len(unique_tiles)

    if use_pallas is None:
        # Kernel traffic ~ B * lane * unique_tiles (+ tiny output), independent of N.
        use_pallas = (B * lane * n_unique) >= _SMALL_PROBLEM_ELEMS
    if not use_pallas:
        return x[:, jnp.asarray(norm, dtype=jnp.int32)]

    out_shape = jax.ShapeDtypeStruct((B, num_k), x.dtype)

    if num_k <= _COLLAPSE_MAX_K:
        # ---------------- Collapsed path: no k grid axis, all static ----------
        tb = _batch_tile(B, lane, num_k, n_unique, itemsize)
        nb = pl.cdiv(B, tb)
        tile_pos = {t: i for i, t in enumerate(unique_tiles)}
        col_specs = tuple((tile_pos[t], l) for t, l in zip(tiles, lanes))

        def make_in_map(t):
            def index_map(b):
                return (b, t)
            return index_map

        cost = pl.CostEstimate(
            flops=B * num_k,
            transcendentals=0,
            bytes_accessed=nb * n_unique * tb * lane * itemsize
            + B * num_k * itemsize)

        return pl.pallas_call(
            _make_collapsed_kernel(col_specs),
            out_shape=out_shape,
            grid=(nb,),
            in_specs=[pl.BlockSpec((tb, lane), make_in_map(t))
                      for t in unique_tiles],
            out_specs=pl.BlockSpec((tb, num_k), lambda b: (b, 0)),
            compiler_params=pltpu.CompilerParams(
                dimension_semantics=("parallel",)),
            cost_estimate=cost,
        )(*([x] * n_unique))

    # ---------------- General path: grid over (batch tiles, sorted k) ---------
    tb = _batch_tile(B, lane, num_k, 1, itemsize)
    nb = pl.cdiv(B, tb)
    # Sort k by lane tile: consecutive grid steps with the same input block index
    # skip the repeat HBM->VMEM DMA.  cols[] restores the original output column.
    order = sorted(range(num_k), key=lambda j: (tiles[j], lanes[j]))
    tiles_s = jnp.asarray([tiles[j] for j in order], dtype=jnp.int32)
    lanes_s = jnp.asarray([lanes[j] for j in order], dtype=jnp.int32)
    cols_s = jnp.asarray(order, dtype=jnp.int32)

    cost = pl.CostEstimate(
        flops=B * (lane + 1) * num_k,
        transcendentals=0,
        bytes_accessed=nb * n_unique * tb * lane * itemsize
        + B * num_k * itemsize)

    return pl.pallas_call(
        _select_kth_kernel,
        out_shape=out_shape,
        grid_spec=pltpu.PrefetchScalarGridSpec(
            num_scalar_prefetch=3,
            grid=(nb, num_k),
            in_specs=[
                # Fetch only the 128-lane tile containing sorted column j.
                pl.BlockSpec((tb, lane),
                             lambda b, j, t_ref, l_ref, c_ref: (b, t_ref[j])),
            ],
            # Same output block for every j -> VMEM resident across the k axis.
            out_specs=pl.BlockSpec((tb, num_k),
                                   lambda b, j, t_ref, l_ref, c_ref: (b, 0)),
        ),
        compiler_params=pltpu.CompilerParams(
            dimension_semantics=("parallel", "arbitrary")),
        cost_estimate=cost,
    )(tiles_s, lanes_s, cols_s, x)


# --------------------------------------------------------------------------- #
# Self-test
# --------------------------------------------------------------------------- #
if __name__ == "__main__":
    key = jax.random.PRNGKey(0)

    # Small shapes consistent with the module: batch=8 rows, 32 logits per row.
    B, N = 8, 32
    x = jax.random.normal(key, (B, N), dtype=jnp.float32)

    # --- int k path (collapsed kernel, forced) -> (B, 1) ---
    out_int = select_kth_logit(x, 5, use_pallas=True)
    jax.block_until_ready(out_int)
    assert out_int.shape == (B, 1)
    assert jnp.allclose(out_int, x[:, 5:6])

    # --- short list with a negative index (collapsed kernel) -> (B, 3) ---
    out_list = select_kth_logit(x, [2, 7, -1], use_pallas=True)
    jax.block_until_ready(out_list)
    assert out_list.shape == (B, 3)
    assert jnp.allclose(out_list, x[:, jnp.asarray([2, 7, N - 1])])

    # --- wider rows: multiple 128-lane tiles, duplicates, still collapsed ---
    B2, N2 = 16, 512
    x2 = jax.random.normal(jax.random.PRNGKey(1), (B2, N2), dtype=jnp.float32)
    k2 = [3, 200, 200, 511, -5]
    out2 = select_kth_logit(x2, k2, use_pallas=True)
    jax.block_until_ready(out2)
    assert out2.shape == (B2, len(k2))
    assert jnp.allclose(out2, x2[:, jnp.asarray([3, 200, 200, 511, N2 - 5])])

    # --- long k list: general (sorted-k grid) path, dup/negative indices ---
    k3 = [5, 1, 300, 300, 129, 511, -1, 64, 63, 250, 7, 400]
    out3 = select_kth_logit(x2, k3, use_pallas=True)
    jax.block_until_ready(out3)
    k3_ref = [ki + N2 if ki < 0 else ki for ki in k3]
    assert out3.shape == (B2, len(k3))
    assert jnp.allclose(out3, x2[:, jnp.asarray(k3_ref)])

    # --- ragged batch (B not a multiple of 8): Pallas pads the last block ---
    B4, N4 = 12, 256
    x4 = jax.random.normal(jax.random.PRNGKey(2), (B4, N4), dtype=jnp.float32)
    out4 = select_kth_logit(x4, [0, 255], use_pallas=True)
    jax.block_until_ready(out4)
    assert out4.shape == (B4, 2)
    assert jnp.allclose(out4, x4[:, jnp.asarray([0, 255])])

    # --- auto path at tiny traffic falls back to a plain XLA gather ---
    out_auto = select_kth_logit(x, 5)
    jax.block_until_ready(out_auto)
    assert jnp.allclose(out_auto, x[:, 5:6])

    # --- out-of-range static k raises like torch ---
    try:
        select_kth_logit(x, N)
        raise AssertionError("expected IndexError")
    except IndexError:
        pass

    print("KERNEL_OK")
</pallas_src>

<mosaic_0001>
module attributes {stable_mosaic.version = 11 : i64} {
  func.func @kernel(%arg0: i32, %arg1: memref<8x32xf32, #tpu.memory_space<vmem>>, %arg2: memref<8x1xf32, #tpu.memory_space<vmem>>) attributes {dimension_semantics = [#tpu.dimension_semantics<parallel>], iteration_bounds = array<i64: 1>, scalar_prefetch = 0 : i64, scratch_operands = 0 : i64, tpu.core_type = #tpu.core_type<tc>, window_params = [{transform_indices = @transform_0, window_bounds = array<i64: 8, 32>}, {transform_indices = @transform_1, window_bounds = array<i64: 8, 1>}]} {
    %c0 = arith.constant 0 : index
    %c5 = arith.constant 5 : index
    %0 = vector.load %arg1[%c0, %c5] : memref<8x32xf32, #tpu.memory_space<vmem>>, vector<8x1xf32>
    %c0_0 = arith.constant 0 : index
    %c0_1 = arith.constant 0 : index
    %1 = vector.load %arg2[%c0_0, %c0_1] : memref<8x1xf32, #tpu.memory_space<vmem>>, vector<8x1xf32>
    tpu.vector_store %arg2[%c0_0, %c0_1], %0 {strides = array<i32>} : memref<8x1xf32, #tpu.memory_space<vmem>>, vector<8x1xf32>,
    return
  }
  func.func @transform_0(%arg0: i32) -> (i32, i32) {
    %c0_i32 = arith.constant 0 : i32
    %c0_i32_0 = arith.constant 0 : i32
    return %arg0, %c0_i32 : i32, i32
  }
  func.func @transform_1(%arg0: i32) -> (i32, i32) {
    %c0_i32 = arith.constant 0 : i32
    %c0_i32_0 = arith.constant 0 : i32
    return %arg0, %c0_i32 : i32, i32
  }
}

</mosaic_0001>

<bundles_post_ra>
// kernel: tpu_custom_call.1
= control target key start
LH: loop header
LB: loop body
LE: loop exit
PB: predicated region body
PF: predicated region fallthrough
CT: control target
= control target key end

     0   :  { %6 = vsyncpa [#allocation3], 0  ;;  %s58_s6 = smov [#allocation2]   ;;  %s85_s0 = inlined_call_operand.hbm [shape: f32[8,32], index: 0, kind: input, shape index: {}]   ;;  %s86_s1 = inlined_call_operand.vmem [shape: f32[8,1], index: 1, kind: output, shape index: {}]  }
   0x1   :  { %s13_s7 = sshll.u32 %s58_s6, 4  ;;  %s34_s10 = scalar_lea.hbm %s85_s0, 128  ;;  %s14_s7 = int_to_ptr.vmem [resolvable:$true] %s13_s7 }
   0x2   :  { %p35_p0 = scmp.ne.s32.totalorder %s85_s0, %s34_s10  ;;  %p38_p1 = scmp.lt.u32.totalorder %s34_s10, %s85_s0 }
   0x4   :  { %p40_p2 = pnand %p38_p1, %p35_p0 }
   0x6   :  { %43 = shalt.err (!%p40_p2)
}
   0x7   :  { %s44_s15 = scalar_lea.vmem %s14_s7, 128  ;;  %p49_p4 = scmp.lt.s32.totalorder %s14_s7, %s14_s7 }
   0x8   :  { %p45_p3 = scmp.ne.s32.totalorder %s14_s7, %s44_s15  ;;  %p50_p5 = scmp.lt.s32.totalorder %s44_s15, %s44_s15 }
   0xa   :  { %p51_p6 = por %p50_p5, %p49_p4 }
   0xc   :  { %p52_p7 = pnand %p51_p6, %p45_p3 }
   0xe   :  { %55 = shalt.err (!%p52_p7)
}
   0xf   :  { %16 = dma.hbm_to_vmem [thread:$0]  %s85_s0, 128, %s14_s7, [#allocation3]  }
  0x10   :  { %56 = dma.done.wait [#allocation3], 128  }
  0x11   :  { %57 = vsyncadd [#allocation3], 4294967168  ;;  %v20_v0 = vld [vmem:[#allocation2] sm:$0xff]  ;;  %s59_s18 = smov 123   ;;  %vm25_vm0 = vcmask 7168  }
  0x12   :  { %22 = vrot.lane.b32.xlu0 %v20_v0, %s59_s18 }
  0x84   :  { %v23_v1 = vpop.permute.xlu0 %22 }
  0x85   :  { %26 = vst.msk [vmem:[%s86_s1] sm:$0xff] %vm25_vm0, %v23_v1 }
  0x86   :  { %31 = vsyncpa [#allocation3], 1 }

</bundles_post_ra>
